<compile_context>
chip_gen: v6e
topology: v6e:2x2x1
jax: 0.10.0
libtpu: 0.0.40
codegen_flags: <defaults>
</compile_context>

<pallas_src>
import functools

import jax
import jax.numpy as jnp
from jax.experimental import pallas as pl
from jax.experimental.pallas import tpu as pltpu


# ----------------------------- helpers -----------------------------

def _round_up(n, m):
    return ((n + m - 1) // m) * m


_K_TILE = 512          # max D_in reduction tile
_MAX_ROW_TILE = 256    # full MXU height on v6e/v7x; fine (2 pushes) on v5e


def _pad_lane(n):
    """Lane-dense padding; prefer 256-multiples (full v6e/v7x MXU) past 128."""
    return 128 if n <= 128 else _round_up(n, 256)


def _pad_d(d_in):
    """(d_pad, tk): pad D_in only to 128 if it fits one K step, else to _K_TILE."""
    d128 = _round_up(d_in, 128)
    if d128 <= _K_TILE:
        return d128, d128
    return _round_up(d_in, _K_TILE), _K_TILE


def _vmem_limit_bytes():
    """Per-generation scoped-VMEM budget (v7x has 64 MiB physical, v5e/v6e 128)."""
    mib = 1024 * 1024
    try:
        cap = int(pltpu.get_tpu_info().vmem_capacity_bytes)
    except Exception:
        return 48 * mib
    return 48 * mib if cap <= 64 * mib else 64 * mib


# ----------------------------- Pallas kernel -----------------------------

def _multihead_kernel(task_ref, x_ref, w1_ref, b1_ref, hw_ref, hb_ref,
                      o_ref, acc_ref):
    """Fused backbone Linear (tiled over D_in) + ReLU + selected head Linear.

    task_ref: (1,) int32 SMEM scalar prefetch (consumed by the index_maps)
    x_ref   : (TM, TK)   bf16  flattened-input tile
    w1_ref  : (TK, Fp)   bf16  backbone weight K-tile
    b1_ref  : (1, Fp)    f32   backbone bias (resident, Buffered(1))
    hw_ref  : (Fp, Cp)   bf16  selected head weight (leading dim squeezed)
    hb_ref  : (1, Cp)    f32   selected head bias   (leading dim squeezed)
    o_ref   : (TM, Cp)   f32   padded logits
    acc_ref : (TM, Fp)   f32   VMEM accumulator for the backbone matmul
    """
    del task_ref  # only used by the BlockSpec index_maps
    k = pl.program_id(1)

    @pl.when(k == 0)
    def _():
        # Fold the backbone bias into the accumulator init.
        acc_ref[...] = jnp.broadcast_to(b1_ref[...], acc_ref.shape)

    acc_ref[...] += jnp.dot(x_ref[...], w1_ref[...],
                            preferred_element_type=jnp.float32)

    @pl.when(k == pl.num_programs(1) - 1)
    def _():
        # ReLU in f32; cast to bf16 only to feed the head MXU matmul.
        h = jnp.maximum(acc_ref[...], 0.0)
        out = jnp.dot(h.astype(hw_ref.dtype), hw_ref[...],
                      preferred_element_type=jnp.float32)
        o_ref[...] = (out + hb_ref[...]).astype(o_ref.dtype)


# ----------------------------- wrapper -----------------------------

def prepare_params(params):
    """One-time pad + bf16 cast of the weights (padded regions are zero)."""
    w1 = params["backbone_w"]           # (D_in, F)   f32
    b1 = params["backbone_b"]           # (1, F)      f32
    hw = params["heads_w"]              # (NH, F, C)  f32
    hb = params["heads_b"]              # (NH, 1, C)  f32

    d_in, f = w1.shape
    nh, _, c = hw.shape
    f_pad = _pad_lane(f)
    c_pad = _pad_lane(c)
    d_pad, _ = _pad_d(d_in)

    w1_p = jnp.zeros((d_pad, f_pad), jnp.bfloat16)
    w1_p = w1_p.at[:d_in, :f].set(w1.astype(jnp.bfloat16))
    b1_p = jnp.zeros((1, f_pad), jnp.float32).at[:, :f].set(b1)
    hw_p = jnp.zeros((nh, f_pad, c_pad), jnp.bfloat16)
    hw_p = hw_p.at[:, :f, :c].set(hw.astype(jnp.bfloat16))
    hb_p = jnp.zeros((nh, 1, c_pad), jnp.float32).at[:, :, :c].set(hb)

    return {"w1": w1_p, "b1": b1_p, "heads_w": hw_p, "heads_b": hb_p}


def multi_head_forward(x_nchw, prepped, task, *, classes_per_head):
    """Forward: heads[task](relu(flatten(x) @ W1 + b1)).  `task` is dynamic."""
    B = x_nchw.shape[0]
    x_flat = x_nchw.reshape(B, -1)                     # NCHW row-major flatten
    d_in = x_flat.shape[1]

    w1 = prepped["w1"]                                 # (Dp, Fp) bf16
    b1 = prepped["b1"]                                 # (1, Fp)  f32
    hw = prepped["heads_w"]                            # (NH, Fp, Cp) bf16
    hb = prepped["heads_b"]                            # (NH, 1, Cp)  f32
    d_pad, f_pad = w1.shape
    num_heads, _, c_pad = hw.shape
    tk = min(_K_TILE, d_pad)
    assert d_pad % tk == 0 and d_pad >= d_in

    # Row tile: collapse small batches into a single tile so w1 is streamed
    # from HBM exactly once; cap at 256 (full MXU height on v6e/v7x).
    b16 = _round_up(max(B, 1), 16)
    tm = b16 if b16 <= _MAX_ROW_TILE else _MAX_ROW_TILE
    b_pad = _round_up(B, tm)

    xb = x_flat.astype(jnp.bfloat16)
    if (b_pad, d_pad) == (B, d_in):
        x_p = xb                                       # no extra pad copy
    else:
        x_p = jnp.zeros((b_pad, d_pad), jnp.bfloat16).at[:B, :d_in].set(xb)

    # Clamp so a bad task id can never trigger an out-of-bounds head DMA.
    task_arr = jnp.clip(jnp.asarray(task, jnp.int32),
                        0, num_heads - 1).reshape((1,))

    resident = pl.Buffered(1)   # constant block index -> no double buffer
    grid = (b_pad // tm, d_pad // tk)
    grid_spec = pltpu.PrefetchScalarGridSpec(
        num_scalar_prefetch=1,
        grid=grid,
        in_specs=[
            pl.BlockSpec((tm, tk), lambda i, k, t: (i, k)),            # x tile
            pl.BlockSpec((tk, f_pad), lambda i, k, t: (k, 0)),         # w1 K-tile
            pl.BlockSpec((1, f_pad), lambda i, k, t: (0, 0),
                         pipeline_mode=resident),                      # b1
            pl.BlockSpec((pl.Squeezed(), f_pad, c_pad),
                         lambda i, k, t: (t[0], 0, 0),
                         pipeline_mode=resident),                      # head W
            pl.BlockSpec((pl.Squeezed(), 1, c_pad),
                         lambda i, k, t: (t[0], 0, 0),
                         pipeline_mode=resident),                      # head b
        ],
        out_specs=pl.BlockSpec((tm, c_pad), lambda i, k, t: (i, 0)),
        scratch_shapes=[pltpu.VMEM((tm, f_pad), jnp.float32)],
    )

    out_pad = pl.pallas_call(
        _multihead_kernel,
        out_shape=jax.ShapeDtypeStruct((b_pad, c_pad), jnp.float32),
        grid_spec=grid_spec,
        compiler_params=pltpu.CompilerParams(
            dimension_semantics=("parallel", "arbitrary"),
            vmem_limit_bytes=_vmem_limit_bytes(),
        ),
    )(task_arr, x_p, w1, b1, hw, hb)

    return out_pad[:B, :classes_per_head]


# ----------------------------- parameter setup -----------------------------

def init_params(key, *, in_channels, height, width, in_features,
                num_heads, classes_per_head):
    d_in = in_channels * height * width
    k1, k2, k3, k4 = jax.random.split(key, 4)
    backbone_w = jax.random.normal(k1, (d_in, in_features), jnp.float32) * 0.02
    backbone_b = jax.random.normal(k2, (1, in_features), jnp.float32) * 0.02
    heads_w = jax.random.normal(
        k3, (num_heads, in_features, classes_per_head), jnp.float32) * 0.02
    heads_b = jax.random.normal(
        k4, (num_heads, 1, classes_per_head), jnp.float32) * 0.02
    return {
        "backbone_w": backbone_w,
        "backbone_b": backbone_b,
        "heads_w": heads_w,
        "heads_b": heads_b,
    }


# ----------------------------- demo / check -----------------------------

if __name__ == "__main__":
    B, C, H, W = 2, 4, 16, 16
    IN_FEATURES = 32
    NUM_HEADS = 3
    CLASSES_PER_HEAD = 10
    TASK = 1

    key = jax.random.PRNGKey(0)
    kx, kp = jax.random.split(key)
    x = jax.random.normal(kx, (B, C, H, W), jnp.float32)
    params = init_params(
        kp,
        in_channels=C, height=H, width=W,
        in_features=IN_FEATURES,
        num_heads=NUM_HEADS,
        classes_per_head=CLASSES_PER_HEAD,
    )
    prepped = prepare_params(params)

    fwd = jax.jit(functools.partial(
        multi_head_forward, classes_per_head=CLASSES_PER_HEAD))

    # Pure-JAX f32 reference (same math as the PyTorch module).
    def reference(task):
        x_flat = x.reshape(B, -1)
        h = jnp.maximum(x_flat @ params["backbone_w"] + params["backbone_b"], 0.0)
        return h @ params["heads_w"][task] + params["heads_b"][task]

    # NOTE: operands are bf16 (f32 MXU accumulation), so results differ from
    # the f32 reference at ~1e-3 level; tolerance below reflects that.
    out = fwd(x, prepped, jnp.int32(TASK))
    jax.block_until_ready(out)
    assert out.shape == (B, CLASSES_PER_HEAD)
    assert jnp.allclose(out, reference(TASK), atol=2e-2, rtol=2e-2)

    # Dynamic task switch: same compiled kernel, different head via scalar prefetch.
    out0 = fwd(x, prepped, jnp.int32(0))
    jax.block_until_ready(out0)
    assert jnp.allclose(out0, reference(0), atol=2e-2, rtol=2e-2)

    print("KERNEL_OK")
</pallas_src>

<mosaic_0001>
module attributes {stable_mosaic.version = 11 : i64} {
  func.func @_multihead_kernel(%arg0: i32, %arg1: i32, %arg2: memref<1xi32, #tpu.memory_space<smem>>, %arg3: memref<16x512xbf16, #tpu.memory_space<vmem>>, %arg4: memref<512x128xbf16, #tpu.memory_space<vmem>>, %arg5: memref<1x128xf32, #tpu.memory_space<vmem>>, %arg6: memref<1x128x128xbf16, #tpu.memory_space<vmem>>, %arg7: memref<1x1x128xf32, #tpu.memory_space<vmem>>, %arg8: memref<16x128xf32, #tpu.memory_space<vmem>>, %arg9: memref<16x128xf32, #tpu.memory_space<vmem>>) attributes {dimension_semantics = [#tpu.dimension_semantics<parallel>, #tpu.dimension_semantics<arbitrary>], iteration_bounds = array<i64: 1, 2>, scalar_prefetch = 1 : i64, scratch_operands = 1 : i64, tpu.core_type = #tpu.core_type<tc>, window_params = [{transform_indices = @transform_0, window_bounds = array<i64: 16, 512>}, {transform_indices = @transform_1, window_bounds = array<i64: 512, 128>}, {pipeline_mode = #tpu.pipeline_mode<synchronous>, transform_indices = @transform_2, window_bounds = array<i64: 1, 128>}, {pipeline_mode = #tpu.pipeline_mode<synchronous>, transform_indices = @transform_3, window_bounds = array<i64: 1, 128, 128>}, {pipeline_mode = #tpu.pipeline_mode<synchronous>, transform_indices = @transform_4, window_bounds = array<i64: 1, 1, 128>}, {transform_indices = @transform_5, window_bounds = array<i64: 16, 128>}]} {
    %c0_i32 = arith.constant 0 : i32
    %0 = arith.cmpi eq, %arg1, %c0_i32 : i32
    %1 = arith.extui %0 : i1 to i32
    %c0_i32_0 = arith.constant 0 : i32
    %2 = arith.cmpi ne, %1, %c0_i32_0 : i32
    scf.if %2 {
      %c0_9 = arith.constant 0 : index
      %c0_10 = arith.constant 0 : index
      %12 = vector.load %arg5[%c0_9, %c0_10] : memref<1x128xf32, #tpu.memory_space<vmem>>, vector<1x128xf32>
      %13 = vector.shape_cast %12 : vector<1x128xf32> to vector<1x128xf32>
      %14 = vector.broadcast %13 : vector<1x128xf32> to vector<16x128xf32>
      %c0_11 = arith.constant 0 : index
      %c0_12 = arith.constant 0 : index
      %15 = vector.load %arg9[%c0_11, %c0_12] : memref<16x128xf32, #tpu.memory_space<vmem>>, vector<16x128xf32>
      tpu.vector_store %arg9[%c0_11, %c0_12], %14 {strides = array<i32>} : memref<16x128xf32, #tpu.memory_space<vmem>>, vector<16x128xf32>,
    } else {
    }
    %c0 = arith.constant 0 : index
    %c0_1 = arith.constant 0 : index
    %3 = vector.load %arg9[%c0, %c0_1] : memref<16x128xf32, #tpu.memory_space<vmem>>, vector<16x128xf32>
    %c0_2 = arith.constant 0 : index
    %c0_3 = arith.constant 0 : index
    %4 = vector.load %arg3[%c0_2, %c0_3] : memref<16x512xbf16, #tpu.memory_space<vmem>>, vector<16x512xbf16>
    %c0_4 = arith.constant 0 : index
    %c0_5 = arith.constant 0 : index
    %5 = vector.load %arg4[%c0_4, %c0_5] : memref<512x128xbf16, #tpu.memory_space<vmem>>, vector<512x128xbf16>
    %cst = arith.constant dense<0.000000e+00> : vector<16x128xf32>
    %6 = tpu.matmul %4, %5, %cst {dimension_numbers = #tpu.dot_dimension_numbers<[1], [0], [0], [1], [0, 0, 1, 1], [], []>} : vector<16x512xbf16>, vector<512x128xbf16>, vector<16x128xf32> -> vector<16x128xf32>
    %7 = arith.addf %3, %6 : vector<16x128xf32>
    %c0_6 = arith.constant 0 : index
    %c0_7 = arith.constant 0 : index
    %8 = vector.load %arg9[%c0_6, %c0_7] : memref<16x128xf32, #tpu.memory_space<vmem>>, vector<16x128xf32>
    tpu.vector_store %arg9[%c0_6, %c0_7], %7 {strides = array<i32>} : memref<16x128xf32, #tpu.memory_space<vmem>>, vector<16x128xf32>,
    %c1_i32 = arith.constant 1 : i32
    %9 = arith.cmpi eq, %arg1, %c1_i32 : i32
    %10 = arith.extui %9 : i1 to i32
    %c0_i32_8 = arith.constant 0 : i32
    %11 = arith.cmpi ne, %10, %c0_i32_8 : i32
    scf.if %11 {
      %c0_9 = arith.constant 0 : index
      %c0_10 = arith.constant 0 : index
      %12 = vector.load %arg9[%c0_9, %c0_10] : memref<16x128xf32, #tpu.memory_space<vmem>>, vector<16x128xf32>
      %cst_11 = arith.constant 0.000000e+00 : f32
      %13 = vector.broadcast %cst_11 : f32 to vector<16x128xf32>
      %14 = arith.maximumf %12, %13 : vector<16x128xf32>
      %15 = arith.truncf %14 : vector<16x128xf32> to vector<16x128xbf16>
      %c0_12 = arith.constant 0 : index
      %c0_13 = arith.constant 0 : index
      %c0_14 = arith.constant 0 : index
      %16 = vector.load %arg6[%c0_12, %c0_13, %c0_14] : memref<1x128x128xbf16, #tpu.memory_space<vmem>>, vector<1x128x128xbf16>
      %17 = vector.shape_cast %16 : vector<1x128x128xbf16> to vector<128x128xbf16>
      %cst_15 = arith.constant dense<0.000000e+00> : vector<16x128xf32>
      %18 = tpu.matmul %15, %17, %cst_15 {dimension_numbers = #tpu.dot_dimension_numbers<[1], [0], [0], [1], [0, 0, 1, 1], [], []>} : vector<16x128xbf16>, vector<128x128xbf16>, vector<16x128xf32> -> vector<16x128xf32>
      %c0_16 = arith.constant 0 : index
      %c0_17 = arith.constant 0 : index
      %c0_18 = arith.constant 0 : index
      %19 = vector.load %arg7[%c0_16, %c0_17, %c0_18] : memref<1x1x128xf32, #tpu.memory_space<vmem>>, vector<1x1x128xf32>
      %20 = vector.shape_cast %19 : vector<1x1x128xf32> to vector<1x128xf32>
      %21 = vector.broadcast %20 : vector<1x128xf32> to vector<16x128xf32>
      %22 = arith.addf %18, %21 : vector<16x128xf32>
      %c0_19 = arith.constant 0 : index
      %c0_20 = arith.constant 0 : index
      %23 = vector.load %arg8[%c0_19, %c0_20] : memref<16x128xf32, #tpu.memory_space<vmem>>, vector<16x128xf32>
      tpu.vector_store %arg8[%c0_19, %c0_20], %22 {strides = array<i32>} : memref<16x128xf32, #tpu.memory_space<vmem>>, vector<16x128xf32>,
    } else {
    }
    return
  }
  func.func @transform_0(%arg0: i32, %arg1: i32, %arg2: memref<1xi32, #tpu.memory_space<smem>>) -> (i32, i32) {
    %c0_i32 = arith.constant 0 : i32
    return %arg0, %arg1 : i32, i32
  }
  func.func @transform_1(%arg0: i32, %arg1: i32, %arg2: memref<1xi32, #tpu.memory_space<smem>>) -> (i32, i32) {
    %c0_i32 = arith.constant 0 : i32
    %c0_i32_0 = arith.constant 0 : i32
    return %arg1, %c0_i32 : i32, i32
  }
  func.func @transform_2(%arg0: i32, %arg1: i32, %arg2: memref<1xi32, #tpu.memory_space<smem>>) -> (i32, i32) {
    %c0_i32 = arith.constant 0 : i32
    %c0_i32_0 = arith.constant 0 : i32
    %c0_i32_1 = arith.constant 0 : i32
    return %c0_i32, %c0_i32_0 : i32, i32
  }
  func.func @transform_3(%arg0: i32, %arg1: i32, %arg2: memref<1xi32, #tpu.memory_space<smem>>) -> (i32, i32, i32) {
    %c0 = arith.constant 0 : index
    %0 = memref.load %arg2[%c0] : memref<1xi32, #tpu.memory_space<smem>>
    %c0_i32 = arith.constant 0 : i32
    %c0_i32_0 = arith.constant 0 : i32
    %c0_i32_1 = arith.constant 0 : i32
    return %0, %c0_i32, %c0_i32_0 : i32, i32, i32
  }
  func.func @transform_4(%arg0: i32, %arg1: i32, %arg2: memref<1xi32, #tpu.memory_space<smem>>) -> (i32, i32, i32) {
    %c0 = arith.constant 0 : index
    %0 = memref.load %arg2[%c0] : memref<1xi32, #tpu.memory_space<smem>>
    %c0_i32 = arith.constant 0 : i32
    %c0_i32_0 = arith.constant 0 : i32
    %c0_i32_1 = arith.constant 0 : i32
    return %0, %c0_i32, %c0_i32_0 : i32, i32, i32
  }
  func.func @transform_5(%arg0: i32, %arg1: i32, %arg2: memref<1xi32, #tpu.memory_space<smem>>) -> (i32, i32) {
    %c0_i32 = arith.constant 0 : i32
    %c0_i32_0 = arith.constant 0 : i32
    return %arg0, %c0_i32 : i32, i32
  }
}

</mosaic_0001>

<bundles_post_ra>
// kernel: multi_head_forward.1
= control target key start
LH: loop header
LB: loop body
LE: loop exit
PB: predicated region body
PF: predicated region fallthrough
CT: control target
= control target key end

     0   :  { %s1519_s0 = inlined_call_operand.<no memory space> [shape: s32[1], index: 0, kind: input, shape index: {}]   ;;  %s1520_s1 = inlined_call_operand.vmem [shape: bf16[16,1024], index: 1, kind: input, shape index: {}]   ;;  %s1521_s2 = inlined_call_operand.hbm [shape: bf16[1024,128], index: 2, kind: input, shape index: {}]   ;;  %s1522_s3 = inlined_call_operand.vmem [shape: f32[1,128], index: 3, kind: input, shape index: {}]   ;;  %s1523_s4 = inlined_call_operand.vmem [shape: bf16[3,128,128], index: 4, kind: input, shape index: {}]   ;;  %s1524_s5 = inlined_call_operand.vmem [shape: f32[3,1,128], index: 5, kind: input, shape index: {}]   ;;  %s1525_s6 = inlined_call_operand.vmem [shape: f32[16,128], index: 6, kind: output, shape index: {}]  }
   0x1   :  { %11 = sst [smem:[#allocation4]] %s1519_s0 }
   0x2   :  { %12 = vsyncpa [#allocation7], 0 }
   0x3   :  { %14 = vsyncpa [#allocation7 + $0x1], 0  ;;  %s1351_s23 = smov 0   ;;  %s1353_s24 = smov 0  }
   0x4   :  { %s1355_s25 = smov 0   ;;  %s1357_s26 = smov 0  }
   0x5   :  { %s1359_s27 = smov 0   ;;  %s1361_s28 = smov 0  }
   0x6 LB: > { %s988_s0 = sadd.s32 4294967295, %s1306_s28   ;;  %s29_s29 = sadd.s32 1, %s1302_s27  ;;  %s1306_s28 = sphi %s1361_s28, %s20_s28   ;;  %s1302_s27 = sphi %s1359_s27, %s1532_s27   ;;  %s1298_s26 = sphi %s1357_s26, %s1531_s26   ;;  %s1294_s25 = sphi %s1355_s25, %s1530_s25   ;;  %s1290_s24 = sphi %s1353_s24, %s1529_s24   ;;  %s1286_s23 = sphi %s1351_s23, %s1528_s23  }
   0x7   : > { %p30_p0 = scmp.ge.s32.totalorder %s29_s29, 2  ;;  %s41_s30 = sadd.s32 1, %s1294_s25 }
   0x8   : > { %p48_p1 = scmp.ne.s32.totalorder %s1294_s25, %s1290_s24  ;;  %p49_p2 = scmp.eq.s32.totalorder %s1306_s28, 0 }
   0x9   : > { %s1534_s29 = smov (%p30_p0, %s29_s29), 0  ;;  %p80_p4 = scmp.ne.s32.totalorder %s1290_s24, %s1286_s23 }
   0xa   : > { %p1387_p3 = por %p49_p2, %p48_p1  ;;  %s37_s8 = ssub.s32 %s1302_s27, %s1534_s29 }
   0xb   : > { %p81_p5 = scmp.eq.s32.totalorder %s988_s0, 0  ;;  %p39_p6 = scmp.eq.s32.totalorder %s37_s8, 0 }
   0xc   : > { %p990_p8 = scmp.ge.s32.totalorder %s1306_s28, 2 }
   0xd   : > { %p1394_p7 = por %p81_p5, %p80_p4 }
   0xe   : > { %s1399_s10 = scalar_select %p39_p6, %s1294_s25, %s41_s30  }
   0xf   : > { %224 = sbr.rel (%p990_p8) target bundleno = 42 (0x2a), region = 28 }
  0x14   : > { %227 = sbr.rel (!%p1387_p3) target bundleno = 26 (0x1a), region = 32  ;;  %s229_s11 = sand.u32 (%p1387_p3), 1, %s1294_s25  }
  0x15   : > { %s1054_s12 = sshll.u32 (%p1387_p3), %s1302_s27, 4  ;;  %s991_s13 = sshll.u32 (%p1387_p3), %s229_s11, 5 }
  0x16   : > { %s237_s16 = scalar_lea.vmem (%p1387_p3), %s1520_s1, %s1054_s12  ;;  %s231_s17 = scalar_lea.vmem (%p1387_p3), [#allocation5], %s991_s13 }
  0x17   : > { %v250_v0 = vld [vmem:[%s237_s16] sm:$0xff] (%p1387_p3)  ;;  %v252_v1 = vld [vmem:[%s237_s16 + $0x8] sm:$0xff] (%p1387_p3) }
  0x18   : > { %v254_v2 = vld [vmem:[%s237_s16 + $0x20] sm:$0xff] (%p1387_p3)  ;;  %251 = vst [vmem:[%s231_s17] sm:$0xff] (%p1387_p3), %v250_v0  ;;  %253 = vst [vmem:[%s231_s17 + $0x8] sm:$0xff] (%p1387_p3), %v252_v1  ;;  %v256_v3 = vld [vmem:[%s237_s16 + $0x28] sm:$0xff] (%p1387_p3) }
  0x19   : > { %255 = vst [vmem:[%s231_s17 + $0x10] sm:$0xff] %v254_v2  ;;  %257 = vst [vmem:[%s231_s17 + $0x18] sm:$0xff] %v256_v3 }
  0x1a PF: > { %s264_s18 = sand.u32 1, %s1294_s25   ;;  %s1055_s19 = sshll.u32 %s1302_s27, 12 }
  0x1b   : > { %s994_s20 = sshll.u32 %s264_s18, 8  ;;  %s274_s23 = scalar_lea.hbm %s1521_s2, %s1055_s19 }
  0x1c   : > { %s268_s0 = scalar_lea.vmem [#allocation6], %s994_s20  ;;  %s265_s8 = scalar_lea.sflag [#allocation7], %s264_s18 }
  0x1d   : > { %s275_s30 = sshll.u32 %s268_s0, 4  ;;  %s1308_s12 = smov [#allocation6]   ;;  %s276_s30 = int_to_ptr.vmem [resolvable:$true] %s275_s30 }
  0x1e   : > { %s1242_s11 = scalar_lea.vmem %s276_s30, 4096  ;;  %s1246_s13 = sshll.u32 %s1308_s12, 4  ;;  %s1247_s13 = int_to_ptr.vmem [resolvable:$false] %s1246_s13 }
  0x1f   : > { %p1243_p9 = scmp.ne.s32.totalorder %s276_s30, %s1242_s11  ;;  %s1248_s14 = scalar_lea.vmem %s1247_s13, 8192 }
  0x20   : > { %p1249_p12 = scmp.lt.s32.totalorder %s276_s30, %s1247_s13  ;;  %p1250_p13 = scmp.lt.s32.totalorder %s1248_s14, %s1242_s11 }
  0x21   : > { %p1244_p10 = pnand %p1243_p9, %p1387_p3 }
  0x22   : > { %p1251_p0 = por %p1250_p13, %p1249_p12 }
  0x23   : > { %p1245_p11 = pneg %p1244_p10 }
  0x25   : > { %p1252_p1 = pnand %p1251_p0, %p1245_p11 }
  0x27   : > { %1255 = shalt.err (!%p1252_p1)
}
  0x28   : > { %s1309_s15 = smov 64   ;;  %s1310_s16 = smov 4  }
  0x29   : > { %1130 = dma.hbm_to_vmem [thread:$0]  (%p1387_p3), %s274_s23, 4096, %s276_s30, %s265_s8, %s1309_s15, %s1309_s15, %s1310_s16  }
  0x2a PF: > { %p997_p2 = scmp.ge.s32.totalorder %s1306_s28, 1  ;;  %p283_p4 = scmp.lt.s32.totalorder %s1306_s28, 3 }
  0x2c   : > { %p284_p5 = pnand %p997_p2, %p283_p4 }
  0x2d   : > { %s290_s17 = sand.u32 (!%p284_p5), 1, %s1290_s24  }
  0x2e   : > { %287 = sbr.rel (%p284_p5) target bundleno = 539 (0x21b), region = 59  ;;  %s998_s18 = sshll.u32 (!%p284_p5), %s290_s17, 5 }
  0x2f   : > { %s999_s19 = sshll.u32 (!%p284_p5), %s290_s17, 8  ;;  %s1421_s20 = scalar_lea.vmem (!%p284_p5), [#allocation5], %s998_s18 }
  0x30   : > { %s297_s21 = scalar_lea.sflag (!%p284_p5), [#allocation7], %s290_s17  ;;  %s1423_s22 = scalar_lea.vmem (!%p284_p5), [#allocation6], %s999_s19 }
  0x33   : > { %1281 = dma.done.wait (%p1394_p7), %s297_s21, 4096  }
  0x34   : > { %1283 = vsyncadd (%p1394_p7), %s297_s21, 4294963200  ;;  %s344_s7 = sld [smem:[#allocation4]]  ;;  %p1002_p6 = scmp.ne.s32.totalorder %s1298_s26, 0 }
  0x3a   : > { %p345_p3 = scmp.lt.s32.totalorder %s344_s7, 2  ;;  %366 = sbr.rel (%p1002_p6) target bundleno = 65 (0x41), region = 71 }
  0x3c   : > { %s1536_s7 = smov (!%p345_p3, %s344_s7), 2 }
  0x3d   : > { %s1056_s23 = sshll.u32 %s1536_s7, 6  ;;  %s354_s8 = scalar_lea.vmem %s1524_s5, %s1536_s7 }
  0x3e   : > { %s1439_s13 = scalar_lea.vmem %s1523_s4, %s1056_s23 }
  0x3f   : > { %v1003_v4 = vld [vmem:[%s1522_s3] ss:$0 sm:$0xff] }
  0x40   : > { %374 = vst [vmem:[#allocation2] sm:$0xff] %v1003_v4  ;;  %375 = vst [vmem:[#allocation2 + $0x8] sm:$0xff] %v1003_v4 }
  0x41 PF: > { %v1184_v5 = vld [vmem:[%s1423_s22 + $0x78] sm:$0xff]   ;;  %v1188_v9 = vld [vmem:[%s1423_s22 + $0x70] sm:$0xff]   ;;  %v1192_v13 = vld [vmem:[%s1423_s22 + $0x68] sm:$0xff]   ;;  %p1040_p7 = scmp.ne.s32.totalorder %s1298_s26, 1 }
  0x42   : > { %v1185_v6 = vld [vmem:[%s1423_s22 + $0xf8] sm:$0xff]   ;;  %1057 = vmatprep.subr.bf16.mxu0 %v1184_v5  ;;  %v1189_v10 = vld [vmem:[%s1423_s22 + $0xf0] sm:$0xff]   ;;  %v1193_v14 = vld [vmem:[%s1423_s22 + $0xe8] sm:$0xff]  }
  0x43   : > { %v1186_v7 = vld [vmem:[%s1423_s22 + $0x38] sm:$0xff]   ;;  %1079 = vmatprep.subr.bf16.mxu1 %v1185_v6  ;;  %v1190_v11 = vld [vmem:[%s1423_s22 + $0x30] sm:$0xff]   ;;  %v1194_v15 = vld [vmem:[%s1423_s22 + $0x28] sm:$0xff]  }
  0x44   : > { %v1187_v8 = vld [vmem:[%s1423_s22 + $0xb8] sm:$0xff]   ;;  %1058 = vmatpush3.bf16.msra.mxu0 %v1186_v7  ;;  %v1191_v12 = vld [vmem:[%s1423_s22 + $0xb0] sm:$0xff]   ;;  %v1195_v16 = vld [vmem:[%s1423_s22 + $0xa8] sm:$0xff]  }
  0x45   : > { %1080 = vmatpush3.bf16.msra.mxu1 %v1187_v8  ;;  %1059 = vmatprep.subr.bf16.mxu0 %v1188_v9  ;;  %v1196_v17 = vld [vmem:[%s1423_s22 + $0x60] sm:$0xff]   ;;  %v1200_v21 = vld [vmem:[%s1423_s22 + $0x58] sm:$0xff]   ;;  %v1204_v25 = vld [vmem:[%s1423_s22 + $0x50] sm:$0xff]  }
  0x46   : > { %1081 = vmatprep.subr.bf16.mxu1 %v1189_v10  ;;  %v1197_v18 = vld [vmem:[%s1423_s22 + $0xe0] sm:$0xff]   ;;  %v1201_v22 = vld [vmem:[%s1423_s22 + $0xd8] sm:$0xff]   ;;  %v1205_v26 = vld [vmem:[%s1423_s22 + $0xd0] sm:$0xff]  }
  0x47   : > { %v1198_v19 = vld [vmem:[%s1423_s22 + $0x20] sm:$0xff]   ;;  %v1202_v23 = vld [vmem:[%s1423_s22 + $0x18] sm:$0xff]   ;;  %v1206_v27 = vld [vmem:[%s1423_s22 + $0x10] sm:$0xff]  }
  0x48   : > { %1060 = vmatpush3.bf16.msra.mxu0 %v1190_v11  ;;  %v1199_v20 = vld [vmem:[%s1423_s22 + $0xa0] sm:$0xff]   ;;  %v1203_v24 = vld [vmem:[%s1423_s22 + $0x98] sm:$0xff]   ;;  %v1207_v28 = vld [vmem:[%s1423_s22 + $0x90] sm:$0xff]  }
  0x49   : > { %1082 = vmatpush3.bf16.msra.mxu1 %v1191_v12  ;;  %1061 = vmatprep.subr.bf16.mxu0 %v1192_v13  ;;  %v1208_v29 = vld [vmem:[%s1423_s22 + $0x48] sm:$0xff]   ;;  %v1212_v33 = vld [vmem:[%s1423_s22 + $0x40] sm:$0xff]   ;;  %v376_v48 = vld [vmem:[#allocation2] sm:$0xff] }
  0x4a   : > { %1083 = vmatprep.subr.bf16.mxu1 %v1193_v14  ;;  %v1209_v30 = vld [vmem:[%s1423_s22 + $0xc8] sm:$0xff]   ;;  %v1213_v34 = vld [vmem:[%s1423_s22 + $0xc0] sm:$0xff]   ;;  %v377_v56 = vld [vmem:[#allocation2 + $0x8] sm:$0xff] }
  0x4b   : > { %v1210_v31 = vld [vmem:[%s1423_s22 + $0x8] sm:$0xff]   ;;  %v1214_v35 = vld [vmem:[%s1423_s22] sm:$0xff]  }
  0x4c   : > { %1062 = vmatpush3.bf16.msra.mxu0 %v1194_v15  ;;  %v1211_v32 = vld [vmem:[%s1423_s22 + $0x88] sm:$0xff]   ;;  %v1215_v36 = vld [vmem:[%s1423_s22 + $0x80] sm:$0xff]  }
  0x4d   : > { %1084 = vmatpush3.bf16.msra.mxu1 %v1195_v16  ;;  %1063 = vmatprep.subr.bf16.mxu0 %v1196_v17  ;;  %v1216_v37 = vld [vmem:[%s1421_s20] ss:$16 sps:$4 sm:$0xff]   ;;  %v1218_v38 = vld [vmem:[%s1421_s20 + $0x4] ss:$16 sps:$4 sm:$0xff]   ;;  %v1219_v39 = vld [vmem:[%s1421_s20 + $0x8] ss:$16 sps:$4 sm:$0xff]  }
  0x4e   : > { %1085 = vmatprep.subr.bf16.mxu1 %v1197_v18  ;;  %v1221_v40 = vld [vmem:[%s1421_s20 + $0xc] ss:$16 sps:$4 sm:$0xff]   ;;  %690 = vmatprep.mubr.bf16.mxu0 %v1218_v38 }
  0x4f   : > { %731 = vmatprep.mubr.bf16.mxu1 %v1221_v40 }
  0x50   : > { %1064 = vmatpush3.bf16.msra.mxu0 %v1198_v19 }
  0x51   : > { %1086 = vmatpush3.bf16.msra.mxu1 %v1199_v20  ;;  %1065 = vmatprep.subr.bf16.mxu0 %v1200_v21 }
  0x52   : > { %1087 = vmatprep.subr.bf16.mxu1 %v1201_v22 }
  0x54   : > { %1066 = vmatpush3.bf16.msra.mxu0 %v1202_v23 }
  0x55   : > { %1088 = vmatpush3.bf16.msra.mxu1 %v1203_v24  ;;  %1067 = vmatprep.subr.bf16.mxu0 %v1204_v25 }
  0x56   : > { %1089 = vmatprep.subr.bf16.mxu1 %v1205_v26 }
  0x58   : > { %1068 = vmatpush3.bf16.msra.mxu0 %v1206_v27 }
  0x59   : > { %1090 = vmatpush3.bf16.msra.mxu1 %v1207_v28  ;;  %1069 = vmatprep.subr.bf16.mxu0 %v1208_v29 }
  0x5a   : > { %1091 = vmatprep.subr.bf16.mxu1 %v1209_v30 }
  0x5c   : > { %1070 = vmatpush3.bf16.msra.mxu0 %v1210_v31 }
  0x5d   : > { %1092 = vmatpush3.bf16.msra.mxu1 %v1211_v32  ;;  %1071 = vmatprep.subr.bf16.mxu0 %v1212_v33 }
  0x5e   : > { %1093 = vmatprep.subr.bf16.mxu1 %v1213_v34 }
  0x60   : > { %1072 = vmatpush3.bf16.msra.mxu0 %v1214_v35 }
  0x61   : > { %1094 = vmatpush3.bf16.msra.mxu1 %v1215_v36 }
  0x63   : > { %691 = vmatmul.mubr.bf16.vlgmr.msra.gmra.mxu0 %v1216_v37 }
  0x64   : > { %732 = vmatmul.mubr.bf16.vlgmr.msra.gmra.mxu1 %v1219_v39 }
 0x123   : > { %v1073_v41 = vpop.f32.mrf.mxu0 }
 0x124   : > { %v1095_v42 = vpop.f32.mrf.mxu1 }
 0x125   : > { %v1074_v43 = vpop.f32.mrf.mxu0 }
 0x126   : > { %v1075_v44 = vadd.f32 %v1074_v43, %v1073_v41  ;;  %v1096_v45 = vpop.f32.mrf.mxu1 }
 0x127   : > { %v1097_v46 = vadd.f32 %v1096_v45, %v1095_v42  ;;  %v1076_v47 = vpop.f32.mrf.mxu0 }
 0x128   : > { %v1098_v49 = vpop.f32.mrf.mxu1 }
 0x129   : > { %v734_v50 = vadd.f32 %v1097_v46, %v1075_v44  ;;  %v1077_v51 = vpop.f32.mrf.mxu0 }
 0x12a   : > { %v1078_v52 = vadd.f32 %v1077_v51, %v1076_v47  ;;  %v1099_v53 = vpop.f32.mrf.mxu1 }
 0x12b   : > { %v740_v54 = vadd.f32 %v734_v50, %v376_v48  ;;  %v1100_v55 = vadd.f32 %v1099_v53, %v1098_v49 }
 0x12d   : > { %742 = vst [vmem:[#allocation2] sm:$0xff] %v740_v54  ;;  %v737_v57 = vadd.f32 %v1100_v55, %v1078_v52  ;;  %747 = sbr.rel (%p1040_p7) target bundleno = 539 (0x21b), region = 75 }
 0x12f   : > { %v741_v58 = vadd.f32 %v737_v57, %v377_v56 }
 0x131   : > { %743 = vst [vmem:[#allocation2 + $0x8] sm:$0xff] %v741_v58 }
 0x132   : > { %v1222_v59 = vld [vmem:[%s1439_s13 + $0x38] sm:$0xff]   ;;  %v1311_v60 = vmov 0.0   ;;  %v1223_v61 = vld [vmem:[%s1439_s13 + $0x30] sm:$0xff]   ;;  %vm1312_vm0 = vmmov 0   ;;  %v1224_v62 = vld [vmem:[%s1439_s13 + $0x28] sm:$0xff]  }
 0x133   : > { %1110 = vmatprep.subr.bf16.mxu0 %v1311_v60  ;;  %1126 = vmatprep.mubr.msk.bf16.mxu0 %vm1312_vm0, %v1311_v60  ;;  %v1225_v63 = vld [vmem:[%s1439_s13 + $0x20] sm:$0xff]   ;;  %v1226_v0 = vld [vmem:[%s1439_s13 + $0x18] sm:$0xff]   ;;  %v1227_v1 = vld [vmem:[%s1439_s13 + $0x10] sm:$0xff]  }
 0x134   : > { %1111 = vmatpush3.bf16.msra.mxu0 %v1222_v59  ;;  %v1228_v2 = vld [vmem:[%s1439_s13 + $0x8] sm:$0xff]   ;;  %v748_v3 = vld [vmem:[#allocation2] sm:$0xff] }
 0x135   : > { %1112 = vmatprep.subr.bf16.mxu0 %v1311_v60  ;;  %v750_v5 = vmax.f32 %v748_v3, 0.0  ;;  %v1229_v7 = vld [vmem:[%s1439_s13] sm:$0xff]  }
 0x136   : > { %v1041_v9 = vld [vmem:[%s354_s8] ss:$0 sm:$0xff] }
 0x138   : > { %1113 = vmatpush3.bf16.msra.mxu0 %v1223_v61  ;;  %v749_v4 = vld [vmem:[#allocation2 + $0x8] sm:$0xff] }
 0x139   : > { %1114 = vmatprep.subr.bf16.mxu0 %v1311_v60  ;;  %v751_v6 = vmax.f32 %v749_v4, 0.0 }
 0x13b   : > { %v752_v8 = vpack.c.bf16 %v751_v6, %v750_v5 }
 0x13c   : > { %1115 = vmatpush3.bf16.msra.mxu0 %v1224_v62 }
 0x13d   : > { %1116 = vmatprep.subr.bf16.mxu0 %v1311_v60 }
 0x140   : > { %1117 = vmatpush3.bf16.msra.mxu0 %v1225_v63 }
 0x141   : > { %1118 = vmatprep.subr.bf16.mxu0 %v1311_v60 }
 0x144   : > { %1119 = vmatpush3.bf16.msra.mxu0 %v1226_v0 }
 0x145   : > { %1120 = vmatprep.subr.bf16.mxu0 %v1311_v60 }
 0x148   : > { %1121 = vmatpush3.bf16.msra.mxu0 %v1227_v1 }
 0x149   : > { %1122 = vmatprep.subr.bf16.mxu0 %v1311_v60 }
 0x14c   : > { %1123 = vmatpush3.bf16.msra.mxu0 %v1228_v2 }
 0x14d   : > { %1124 = vmatprep.subr.bf16.mxu0 %v1311_v60 }
 0x150   : > { %1125 = vmatpush3.bf16.msra.mxu0 %v1229_v7 }
 0x153   : > { %1127 = vmatmul.mubr.bf16.vlgmr.msra.gmra.mxu0 %v752_v8 }
 0x213   : > { %v858_v10 = vpop.f32.mrf.mxu0 }
 0x214   : > { %v859_v11 = vadd.f32 %v1041_v9, %v858_v10 }
 0x215   : > { %v1128_v12 = vpop.f32.mrf.mxu0 }
 0x216   : > { %865 = vst [vmem:[%s1525_s6] sm:$0xff] %v859_v11 }
 0x217   : > { %v861_v13 = vpop.f32.mrf.mxu0 }
 0x218   : > { %v862_v14 = vadd.f32 %v1041_v9, %v861_v13 }
 0x219   : > { %v1129_v15 = vpop.f32.mrf.mxu0 }
 0x21a   : > { %866 = vst [vmem:[%s1525_s6 + $0x8] sm:$0xff] %v862_v14 }
 0x21b PF: > { %s20_s28 = sadd.s32 1, %s1306_s28   ;;  %s1528_s23 = smov %s1290_s24 }
 0x21c   : > { %p17_p8 = scmp.ge.s32.totalorder %s20_s28, 4   ;;  %s1529_s24 = smov %s1294_s25 }
 0x21d   : > { %s1530_s25 = smov %s1399_s10  ;;  %s1531_s26 = smov %s1302_s27 }
 0x21e   : > { %s1532_s27 = smov %s1534_s29  ;;  %19 = sbr.rel (!%p17_p8) target bundleno = 6 (0x6), region = 125 }
 0x223   :  { %889 = vsyncpa [#allocation7], 1 }
 0x224   :  { %891 = vsyncpa [#allocation7 + $0x1], 1 }

</bundles_post_ra>
